<compile_context>
chip_gen: v6e
topology: v6e:2x2x1
jax: 0.10.0
libtpu: 0.0.40
codegen_flags: <defaults>
</compile_context>

<pallas_src>
import jax
import jax.numpy as jnp
from jax.experimental import pallas as pl
from jax.experimental.pallas import tpu as pltpu


def _make_res_mlp_kernel(dim_res):
    """Builds: out_slab = SiLU(x @ W1 + b1) @ W2p + b2p + pad(x[:, :dim_res])."""

    def kernel(x_ref, w1_ref, b1_ref, w2_ref, b2_ref, o_ref):
        x = x_ref[...]                                   # (TM, F_IN) native dtype
        x_bf = x.astype(jnp.bfloat16)                    # in-register cast for the MXU
        # Linear 1 on the MXU (bf16 operands, f32 accumulation) + bias.
        h = jnp.dot(x_bf, w1_ref[...], preferred_element_type=jnp.float32) + b1_ref[...]
        # SiLU in f32 (VPU mul + EUP sigmoid).  If VALU ever binds, switch the divide to
        # h * pl.reciprocal(1.0 + jnp.exp(-h), approx=True) so it rides the EUP slot.
        h = h * jax.nn.sigmoid(h)
        # Linear 2 on the MXU into the 128-wide padded slab + bias.
        out = jnp.dot(h.astype(jnp.bfloat16), w2_ref[...],
                      preferred_element_type=jnp.float32) + b2_ref[...]
        # Exact residual: out[:, j] += x[:, j] (f32) for j < dim_res.  dim_res is tiny, so a
        # couple of lane selects on the VPU are cheaper than a selector matmul and keep the
        # skip connection at full x precision.
        tm, out_pad = out.shape
        col = jax.lax.broadcasted_iota(jnp.int32, (tm, out_pad), 1)
        xf = x.astype(jnp.float32)
        res = jnp.zeros_like(out)
        for j in range(dim_res):                         # static, tiny unroll
            res = jnp.where(col == j, xf[:, j:j + 1], res)
        o_ref[...] = (out + res).astype(o_ref.dtype)

    return kernel


def res_wrapper(x, w1, b1, w2, b2, *, tm_max=1024, min_grid_steps=2,
                slab_dtype=jnp.bfloat16, return_padded_slab=False):
    """Pallas ResWrapper(Linear -> SiLU -> Linear) with residual x[:, :dim_res]."""
    n, f_in = x.shape
    f_in_w, hidden = w1.shape
    hidden_w, dim_res = w2.shape
    assert f_in_w == f_in and hidden_w == hidden
    assert b1.shape == (hidden,) and b2.shape == (dim_res,)
    assert f_in >= dim_res, "ResWrapper requires dim_res <= input feature dim"

    # ---- tiling -------------------------------------------------------------
    out_pad = 128 * pl.cdiv(dim_res, 128)          # lane-dense (>=128 wide) output slab
    steps = max(1, int(min_grid_steps))
    # Big tiles amortize the ~0.35 us per-grid-step overhead; keep >= `steps` grid steps
    # (when N allows) so v7x's two TensorCores both get row tiles.
    tm = min(tm_max, max(8, 8 * pl.cdiv(pl.cdiv(n, steps), 8)))
    n_pad = tm * pl.cdiv(n, tm)
    grid = (n_pad // tm,)

    # x stays in its native dtype; rows are padded only when the tile does not divide N.
    x_p = x if n_pad == n else jnp.pad(x, ((0, n_pad - n), (0, 0)))

    # Tiny, grid-invariant operands: bf16 MXU weights, f32 biases, zero-padded to the slab.
    w1_bf = w1.astype(jnp.bfloat16)
    w2_bf = jnp.pad(w2, ((0, 0), (0, out_pad - dim_res))).astype(jnp.bfloat16)
    b1_2d = b1.reshape(1, hidden).astype(jnp.float32)
    b2_2d = jnp.pad(b2, (0, out_pad - dim_res)).reshape(1, out_pad).astype(jnp.float32)

    flops = 2 * n_pad * f_in * hidden + 2 * n_pad * hidden * out_pad
    transcendentals = n_pad * hidden
    bytes_accessed = (n_pad * f_in * x.dtype.itemsize
                      + 2 * (w1_bf.size + w2_bf.size)
                      + 4 * (b1_2d.size + b2_2d.size)
                      + n_pad * out_pad * jnp.dtype(slab_dtype).itemsize)

    out_slab = pl.pallas_call(
        _make_res_mlp_kernel(dim_res),
        out_shape=jax.ShapeDtypeStruct((n_pad, out_pad), slab_dtype),
        grid_spec=pltpu.PrefetchScalarGridSpec(
            num_scalar_prefetch=0,
            grid=grid,
            in_specs=[
                pl.BlockSpec((tm, f_in), lambda i: (i, 0)),          # x row tile (native dtype)
                pl.BlockSpec((f_in, hidden), lambda i: (0, 0)),      # W1   (VMEM-resident)
                pl.BlockSpec((1, hidden), lambda i: (0, 0)),         # b1   (VMEM-resident)
                pl.BlockSpec((hidden, out_pad), lambda i: (0, 0)),   # W2p  (VMEM-resident)
                pl.BlockSpec((1, out_pad), lambda i: (0, 0)),        # b2p  (VMEM-resident)
            ],
            out_specs=pl.BlockSpec((tm, out_pad), lambda i: (i, 0)), # lane-dense bf16 slab
        ),
        compiler_params=pltpu.CompilerParams(
            dimension_semantics=("parallel",),
            vmem_limit_bytes=32 * 1024 * 1024,
        ),
        cost_estimate=pl.CostEstimate(
            flops=flops,
            transcendentals=transcendentals,
            bytes_accessed=bytes_accessed,
        ),
    )(x_p, w1_bf, b1_2d, w2_bf, b2_2d)

    if return_padded_slab:
        return out_slab                       # fused consumer slices / accepts padded columns
    return out_slab[:n, :dim_res].astype(x.dtype)


def res_wrapper_ref_f32(x, w1, b1, w2, b2):
    """Pure f32 reference of ResWrapper(Linear -> SiLU -> Linear)."""
    h = x @ w1 + b1
    h = h * jax.nn.sigmoid(h)
    return h @ w2 + b2 + x[:, : w2.shape[1]]


def res_wrapper_ref_mixed(x, w1, b1, w2, b2, slab_dtype=jnp.bfloat16):
    """Reference mirroring the kernel's bf16-operand / f32-accumulation / bf16-slab scheme."""
    f32 = jnp.float32
    xb = x.astype(jnp.bfloat16).astype(f32)
    w1b = w1.astype(jnp.bfloat16).astype(f32)
    w2b = w2.astype(jnp.bfloat16).astype(f32)
    h = xb @ w1b + b1.astype(f32)
    h = h * jax.nn.sigmoid(h)
    hb = h.astype(jnp.bfloat16).astype(f32)
    out = hb @ w2b + b2.astype(f32) + x.astype(f32)[:, : w2.shape[1]]   # exact f32 residual
    return out.astype(slab_dtype).astype(x.dtype)


if __name__ == "__main__":
    # Small EGNN-like node batch; N deliberately not a tile multiple to exercise padding.
    N, F_IN, HIDDEN, DIM_RES = 500, 32, 32, 2

    key = jax.random.PRNGKey(0)
    kx, k1, k2, k3, k4 = jax.random.split(key, 5)
    x = jax.random.normal(kx, (N, F_IN), dtype=jnp.float32)
    w1 = jax.random.normal(k1, (F_IN, HIDDEN), dtype=jnp.float32) * 0.1
    b1 = jax.random.normal(k2, (HIDDEN,), dtype=jnp.float32) * 0.1
    w2 = jax.random.normal(k3, (HIDDEN, DIM_RES), dtype=jnp.float32) * 0.1
    b2 = jax.random.normal(k4, (DIM_RES,), dtype=jnp.float32) * 0.1

    out = jax.block_until_ready(res_wrapper(x, w1, b1, w2, b2))
    assert out.shape == (N, DIM_RES), out.shape
    assert out.dtype == x.dtype, out.dtype

    ref_mixed = res_wrapper_ref_mixed(x, w1, b1, w2, b2)
    ref_f32 = res_wrapper_ref_f32(x, w1, b1, w2, b2)
    assert jnp.allclose(out, ref_mixed, atol=2e-2, rtol=2e-2), "mismatch vs mixed-precision ref"
    assert jnp.allclose(out, ref_f32, atol=5e-2, rtol=5e-2), "mismatch vs f32 reference"

    print("KERNEL_OK")
</pallas_src>

<mosaic_0001>
module attributes {stable_mosaic.version = 11 : i64} {
  func.func @kernel(%arg0: i32, %arg1: memref<256x32xf32, #tpu.memory_space<vmem>>, %arg2: memref<32x32xbf16, #tpu.memory_space<vmem>>, %arg3: memref<1x32xf32, #tpu.memory_space<vmem>>, %arg4: memref<32x128xbf16, #tpu.memory_space<vmem>>, %arg5: memref<1x128xf32, #tpu.memory_space<vmem>>, %arg6: memref<256x128xbf16, #tpu.memory_space<vmem>>) attributes {dimension_semantics = [#tpu.dimension_semantics<parallel>], iteration_bounds = array<i64: 2>, scalar_prefetch = 0 : i64, scratch_operands = 0 : i64, tpu.core_type = #tpu.core_type<tc>, window_params = [{transform_indices = @transform_0, window_bounds = array<i64: 256, 32>}, {pipeline_mode = #tpu.pipeline_mode<synchronous>, transform_indices = @transform_1, window_bounds = array<i64: 32, 32>}, {pipeline_mode = #tpu.pipeline_mode<synchronous>, transform_indices = @transform_2, window_bounds = array<i64: 1, 32>}, {pipeline_mode = #tpu.pipeline_mode<synchronous>, transform_indices = @transform_3, window_bounds = array<i64: 32, 128>}, {pipeline_mode = #tpu.pipeline_mode<synchronous>, transform_indices = @transform_4, window_bounds = array<i64: 1, 128>}, {transform_indices = @transform_5, window_bounds = array<i64: 256, 128>}]} {
    %c0 = arith.constant 0 : index
    %c0_0 = arith.constant 0 : index
    %0 = vector.load %arg1[%c0, %c0_0] : memref<256x32xf32, #tpu.memory_space<vmem>>, vector<256x32xf32>
    %1 = arith.truncf %0 : vector<256x32xf32> to vector<256x32xbf16>
    %c0_1 = arith.constant 0 : index
    %c0_2 = arith.constant 0 : index
    %2 = vector.load %arg2[%c0_1, %c0_2] : memref<32x32xbf16, #tpu.memory_space<vmem>>, vector<32x32xbf16>
    %cst = arith.constant dense<0.000000e+00> : vector<256x32xf32>
    %3 = tpu.matmul %1, %2, %cst {dimension_numbers = #tpu.dot_dimension_numbers<[1], [0], [0], [1], [0, 0, 1, 1], [], []>} : vector<256x32xbf16>, vector<32x32xbf16>, vector<256x32xf32> -> vector<256x32xf32>
    %c0_3 = arith.constant 0 : index
    %c0_4 = arith.constant 0 : index
    %4 = vector.load %arg3[%c0_3, %c0_4] : memref<1x32xf32, #tpu.memory_space<vmem>>, vector<1x32xf32>
    %5 = vector.broadcast %4 : vector<1x32xf32> to vector<256x32xf32>
    %6 = arith.addf %3, %5 : vector<256x32xf32>
    %7 = arith.negf %6 : vector<256x32xf32>
    %8 = math.exp %7 : vector<256x32xf32>
    %cst_5 = arith.constant 1.000000e+00 : f32
    %9 = vector.broadcast %cst_5 : f32 to vector<256x32xf32>
    %10 = arith.addf %9, %8 : vector<256x32xf32>
    %11 = arith.divf %9, %10 : vector<256x32xf32>
    %12 = arith.mulf %6, %11 : vector<256x32xf32>
    %13 = arith.truncf %12 : vector<256x32xf32> to vector<256x32xbf16>
    %c0_6 = arith.constant 0 : index
    %c0_7 = arith.constant 0 : index
    %14 = vector.load %arg4[%c0_6, %c0_7] : memref<32x128xbf16, #tpu.memory_space<vmem>>, vector<32x128xbf16>
    %cst_8 = arith.constant dense<0.000000e+00> : vector<256x128xf32>
    %15 = tpu.matmul %13, %14, %cst_8 {dimension_numbers = #tpu.dot_dimension_numbers<[1], [0], [0], [1], [0, 0, 1, 1], [], []>} : vector<256x32xbf16>, vector<32x128xbf16>, vector<256x128xf32> -> vector<256x128xf32>
    %c0_9 = arith.constant 0 : index
    %c0_10 = arith.constant 0 : index
    %16 = vector.load %arg5[%c0_9, %c0_10] : memref<1x128xf32, #tpu.memory_space<vmem>>, vector<1x128xf32>
    %17 = vector.broadcast %16 : vector<1x128xf32> to vector<256x128xf32>
    %18 = arith.addf %15, %17 : vector<256x128xf32>
    %19 = tpu.iota {dimensions = array<i32: 1>} : vector<256x128xi32>
    %cst_11 = arith.constant 0.000000e+00 : f32
    %20 = vector.broadcast %cst_11 : f32 to vector<256x128xf32>
    %c0_i32 = arith.constant 0 : i32
    %21 = vector.broadcast %c0_i32 : i32 to vector<256x128xi32>
    %22 = arith.cmpi eq, %19, %21 : vector<256x128xi32>
    %23 = vector.extract_strided_slice %0 {offsets = [0, 0], sizes = [256, 1], strides = [1, 1]} : vector<256x32xf32> to vector<256x1xf32>
    %24 = vector.shape_cast %23 : vector<256x1xf32> to vector<256x1xf32>
    %25 = vector.broadcast %24 : vector<256x1xf32> to vector<256x128xf32>
    %26 = arith.select %22, %25, %20 : vector<256x128xi1>, vector<256x128xf32>
    %c1_i32 = arith.constant 1 : i32
    %27 = vector.broadcast %c1_i32 : i32 to vector<256x128xi32>
    %28 = arith.cmpi eq, %19, %27 : vector<256x128xi32>
    %29 = vector.extract_strided_slice %0 {offsets = [0, 1], sizes = [256, 1], strides = [1, 1]} : vector<256x32xf32> to vector<256x1xf32>
    %30 = vector.shape_cast %29 : vector<256x1xf32> to vector<256x1xf32>
    %31 = vector.broadcast %30 : vector<256x1xf32> to vector<256x128xf32>
    %32 = arith.select %28, %31, %26 : vector<256x128xi1>, vector<256x128xf32>
    %33 = arith.addf %18, %32 : vector<256x128xf32>
    %34 = arith.truncf %33 : vector<256x128xf32> to vector<256x128xbf16>
    %c0_12 = arith.constant 0 : index
    %c0_13 = arith.constant 0 : index
    %35 = vector.load %arg6[%c0_12, %c0_13] : memref<256x128xbf16, #tpu.memory_space<vmem>>, vector<256x128xbf16>
    tpu.vector_store %arg6[%c0_12, %c0_13], %34 {strides = array<i32>} : memref<256x128xbf16, #tpu.memory_space<vmem>>, vector<256x128xbf16>,
    return
  }
  func.func @transform_0(%arg0: i32) -> (i32, i32) {
    %c0_i32 = arith.constant 0 : i32
    %c0_i32_0 = arith.constant 0 : i32
    return %arg0, %c0_i32 : i32, i32
  }
  func.func @transform_1(%arg0: i32) -> (i32, i32) {
    %c0_i32 = arith.constant 0 : i32
    %c0_i32_0 = arith.constant 0 : i32
    %c0_i32_1 = arith.constant 0 : i32
    return %c0_i32, %c0_i32_0 : i32, i32
  }
  func.func @transform_2(%arg0: i32) -> (i32, i32) {
    %c0_i32 = arith.constant 0 : i32
    %c0_i32_0 = arith.constant 0 : i32
    %c0_i32_1 = arith.constant 0 : i32
    return %c0_i32, %c0_i32_0 : i32, i32
  }
  func.func @transform_3(%arg0: i32) -> (i32, i32) {
    %c0_i32 = arith.constant 0 : i32
    %c0_i32_0 = arith.constant 0 : i32
    %c0_i32_1 = arith.constant 0 : i32
    return %c0_i32, %c0_i32_0 : i32, i32
  }
  func.func @transform_4(%arg0: i32) -> (i32, i32) {
    %c0_i32 = arith.constant 0 : i32
    %c0_i32_0 = arith.constant 0 : i32
    %c0_i32_1 = arith.constant 0 : i32
    return %c0_i32, %c0_i32_0 : i32, i32
  }
  func.func @transform_5(%arg0: i32) -> (i32, i32) {
    %c0_i32 = arith.constant 0 : i32
    %c0_i32_0 = arith.constant 0 : i32
    return %arg0, %c0_i32 : i32, i32
  }
}

</mosaic_0001>

<bundles_post_ra>
// kernel: tpu_custom_call.1
= control target key start
LH: loop header
LB: loop body
LE: loop exit
PB: predicated region body
PF: predicated region fallthrough
CT: control target
= control target key end

     0   :  { %10 = vsyncpa [#allocation3], 0  ;;  %s2994_s0 = inlined_call_operand.vmem [shape: f32[512,32], index: 0, kind: input, shape index: {}]   ;;  %s2995_s1 = inlined_call_operand.vmem [shape: bf16[32,32], index: 1, kind: input, shape index: {}]   ;;  %s2996_s2 = inlined_call_operand.vmem [shape: f32[1,32], index: 2, kind: input, shape index: {}]   ;;  %s2997_s3 = inlined_call_operand.vmem [shape: bf16[32,128], index: 3, kind: input, shape index: {}]   ;;  %s2998_s4 = inlined_call_operand.vmem [shape: f32[1,128], index: 4, kind: input, shape index: {}]   ;;  %s2999_s5 = inlined_call_operand.hbm [shape: bf16[512,128], index: 5, kind: output, shape index: {}]  }
   0x1   :  { %12 = vsyncpa [#allocation3 + $0x1], 0  ;;  %s2230_s18 = smov 0   ;;  %s2232_s19 = smov 0  }
   0x2   :  { %s2234_s20 = smov 0   ;;  %s2236_s21 = smov 0  }
   0x3 LB: > { %s2251_s22 = sadd.s32 4294967295, %s2193_s21   ;;  %s1604_s23 = sadd.s32 4294967294, %s2193_s21   ;;  %s2193_s21 = sphi %s2236_s21, %s3005_s21   ;;  %s2189_s20 = sphi %s2234_s20, %s3004_s20   ;;  %s2185_s19 = sphi %s2232_s19, %s3003_s19   ;;  %s2181_s18 = sphi %s2230_s18, %s3002_s18  }
   0x4   : > { %s2255_s24 = sadd.s32 1, %s2193_s21   ;;  %s135_s25 = sadd.s32 1, %s2189_s20 }
   0x5   : > { %s132_s26 = ssub.s32 %s2193_s21, %s2255_s24  ;;  %p145_p0 = scmp.ne.s32.totalorder %s2189_s20, %s2185_s19 }
   0x6   : > { %p133_p1 = scmp.eq.s32.totalorder %s132_s26, 0  ;;  %p146_p2 = scmp.eq.s32.totalorder %s2251_s22, 1 }
   0x7   : > { %p151_p3 = scmp.ne.s32.totalorder %s2185_s19, %s2181_s18  ;;  %p152_p4 = scmp.eq.s32.totalorder %s1604_s23, 1 }
   0x8   : > { %s2266_s27 = scalar_select %p133_p1, %s2189_s20, %s135_s25  }
   0x9   : > { %p2268_p5 = por %p146_p2, %p145_p0  ;;  %p2272_p6 = por %p152_p4, %p151_p3 }
   0xa   : > { %p1607_p7 = scmp.ge.s32.totalorder %s2193_s21, 1  ;;  %p191_p8 = scmp.lt.s32.totalorder %s2193_s21, 3 }
   0xc   : > { %p192_p9 = pnand %p1607_p7, %p191_p8 }
   0xd   : > { %s1609_s7 = sshll.u32 (!%p192_p9), %s2251_s22, 5  ;;  %s216_s6 = sand.u32 (!%p192_p9), 1, %s2185_s19  }
   0xe   : > { %195 = sbr.rel (%p192_p9) target bundleno = 544 (0x220), region = 40  ;;  %p220_p10 = scmp.lt.s32.totalorder (!%p192_p9), %s1609_s7, 63 }
   0xf   : > { %s1750_s9 = sshll.u32 (!%p192_p9), %s2251_s22, 11  ;;  %s2954_s22 = scalar_lea.sflag (!%p192_p9), [#allocation3], %s216_s6 }
  0x10   : > { %s2197_s15 = smov (!%p192_p9), [#allocation2]  }
  0x11   : > { %s2137_s16 = sshll.u32 (!%p192_p9), %s2197_s15, 4  ;;  %s2138_s16 = int_to_ptr.vmem [resolvable:$false] %s2137_s16 }
  0x12   : > { %s2139_s17 = scalar_lea.vmem (!%p192_p9), %s2138_s16, 4096 }
  0x13   : > { %v2001_v0 = vld [vmem:[%s2995_s1 + $0x8] sm:$0xff]   ;;  %v2002_v1 = vld [vmem:[%s2995_s1] sm:$0xff]   ;;  %s3007_s7 = smov (!%p220_p10, %s1609_s7), 63  ;;  %v2195_v2 = vmov 0   ;;  %vm298_vm0 = vcmask 261120   ;;  %v2196_v51 = vmov 1  }
  0x14   : > { %1882 = vmatprep.subr.bf16.mxu0 %v2001_v0  ;;  %1998 = vset.pattern.permute.xlu1 %v2195_v2  ;;  %s1610_s10 = sshll.u32 %s3007_s7, 3  ;;  %v2003_v52 = vld [vmem:[%s2997_s3 + $0x8] sm:$0xff]   ;;  %v2004_v53 = vld [vmem:[%s2997_s3] sm:$0xff]   ;;  %s1608_s7 = sshll.u32 %s216_s6, 7 }
  0x15   : > { %1883 = vmatpush3.bf16.msra.mxu0 %v2001_v0  ;;  %1997 = vset.pattern.permute.xlu0 %v2195_v2  ;;  %s2288_s13 = scalar_lea.vmem %s2994_s0, %s1610_s10  ;;  %v2467_v54 = vld [vmem:[%s2996_s2] ss:$0 sm:$0xff]  ;;  %s2751_s8 = scalar_lea.vmem [#allocation2], %s1608_s7 }
  0x16   : > { %1884 = vmatprep.subr.bf16.mxu0 %v2002_v1  ;;  %v2291_v3 = vld [vmem:[%s2288_s13] sm:$0xff]  ;;  %v2294_v4 = vld [vmem:[%s2288_s13 + $0x8] sm:$0xff]  ;;  %v2297_v5 = vld [vmem:[%s2288_s13 + $0x10] sm:$0xff]  ;;  %1918 = vmatprep.subr.bf16.mxu1 %v2003_v52  ;;  %s1542_s10 = sshll.u32 %s2751_s8, 4  ;;  %s2948_s10 = int_to_ptr.vmem [resolvable:$true] %s1542_s10 }
  0x17   : > { %v259_v6 = vpack.c.bf16 %v2294_v4, %v2291_v3  ;;  %v2302_v7 = vld [vmem:[%s2288_s13 + $0x18] sm:$0xff]  ;;  %v2305_v8 = vld [vmem:[%s2288_s13 + $0x20] sm:$0xff]  ;;  %v2308_v9 = vld [vmem:[%s2288_s13 + $0x28] sm:$0xff]  ;;  %995 = vperm.xlu1 %1998, %v2297_v5   ;;  %985 = vperm.xlu0 %1997, %v2291_v3   ;;  %s2133_s14 = scalar_lea.vmem %s2948_s10, 2048  ;;  %p2140_p0 = scmp.lt.s32.totalorder %s2948_s10, %s2138_s16 }
  0x18   : > { %v260_v10 = vpack.c.bf16 %v2302_v7, %v2297_v5  ;;  %v261_v11 = vpack.c.bf16 %v2308_v9, %v2305_v8  ;;  %v2320_v12 = vld [vmem:[%s2288_s13 + $0x30] sm:$0xff]  ;;  %v2323_v13 = vld [vmem:[%s2288_s13 + $0x38] sm:$0xff]  ;;  %v2327_v14 = vld [vmem:[%s2288_s13 + $0x40] sm:$0xff]  ;;  %1919 = vmatpush3.bf16.msra.mxu1 %v2003_v52  ;;  %p2134_p11 = scmp.ne.s32.totalorder %s2948_s10, %s2133_s14  ;;  %p2141_p1 = scmp.lt.s32.totalorder %s2139_s17, %s2133_s14 }
  0x19   : > { %1885 = vmatpush3.bf16.msra.mxu0 %v2002_v1  ;;  %1886 = vmatprep.mubr.msk.bf16.mxu0 %vm298_vm0, %v259_v6  ;;  %v2330_v15 = vld [vmem:[%s2288_s13 + $0x48] sm:$0xff]  ;;  %v262_v16 = vpack.c.bf16 %v2323_v13, %v2320_v12  ;;  %v2342_v18 = vld [vmem:[%s2288_s13 + $0x50] sm:$0xff]  ;;  %v2345_v19 = vld [vmem:[%s2288_s13 + $0x58] sm:$0xff] }
  0x1a   : > { %v263_v17 = vpack.c.bf16 %v2330_v15, %v2327_v14  ;;  %v2349_v20 = vld [vmem:[%s2288_s13 + $0x60] sm:$0xff]  ;;  %v2352_v21 = vld [vmem:[%s2288_s13 + $0x68] sm:$0xff]  ;;  %v264_v22 = vpack.c.bf16 %v2345_v19, %v2342_v18  ;;  %v2364_v24 = vld [vmem:[%s2288_s13 + $0x70] sm:$0xff]  ;;  %1920 = vmatprep.subr.bf16.mxu1 %v2004_v53  ;;  %p2135_p12 = pnand %p2134_p11, %p2268_p5  ;;  %p2142_p2 = por %p2141_p1, %p2140_p0 }
  0x1b   : > { %1000 = vperm.xlu1 %1998, %v2302_v7   ;;  %990 = vperm.xlu0 %1997, %v2294_v4   ;;  %v265_v23 = vpack.c.bf16 %v2352_v21, %v2349_v20  ;;  %v2367_v25 = vld [vmem:[%s2288_s13 + $0x78] sm:$0xff]  ;;  %v2371_v26 = vld [vmem:[%s2288_s13 + $0x80] sm:$0xff]  ;;  %v2374_v27 = vld [vmem:[%s2288_s13 + $0x88] sm:$0xff] }
  0x1c   : > { %1887 = vmatmul.mubr.msk.bf16.vlgmr.msra.gmra.mxu0 %vm298_vm0, %v260_v10  ;;  %v266_v28 = vpack.c.bf16 %v2367_v25, %v2364_v24  ;;  %v267_v29 = vpack.c.bf16 %v2374_v27, %v2371_v26  ;;  %v2386_v30 = vld [vmem:[%s2288_s13 + $0x90] sm:$0xff]  ;;  %v2389_v31 = vld [vmem:[%s2288_s13 + $0x98] sm:$0xff]  ;;  %v2393_v32 = vld [vmem:[%s2288_s13 + $0xa0] sm:$0xff]  ;;  %1921 = vmatpush3.bf16.msra.mxu1 %v2004_v53  ;;  %p2136_p13 = pneg %p2135_p12 }
  0x1d   : > { %1890 = vmatprep.mubr.msk.bf16.mxu0 %vm298_vm0, %v261_v11  ;;  %v2396_v33 = vld [vmem:[%s2288_s13 + $0xa8] sm:$0xff]  ;;  %v268_v34 = vpack.c.bf16 %v2389_v31, %v2386_v30  ;;  %v249_v36 = vld [vmem:[%s2288_s13 + $0xb0] sm:$0xff]  ;;  %v250_v37 = vld [vmem:[%s2288_s13 + $0xb8] sm:$0xff] }
  0x1e   : > { %v269_v35 = vpack.c.bf16 %v2396_v33, %v2393_v32  ;;  %v2411_v38 = vld [vmem:[%s2288_s13 + $0xc0] sm:$0xff]  ;;  %v2414_v39 = vld [vmem:[%s2288_s13 + $0xc8] sm:$0xff]  ;;  %v270_v40 = vpack.c.bf16 %v250_v37, %v249_v36  ;;  %v253_v42 = vld [vmem:[%s2288_s13 + $0xd0] sm:$0xff]  ;;  %p2143_p3 = pnand %p2142_p2, %p2136_p13 }
  0x1f   : > { %1010 = vperm.xlu1 %1998, %v2308_v9   ;;  %1005 = vperm.xlu0 %1997, %v2305_v8   ;;  %v271_v41 = vpack.c.bf16 %v2414_v39, %v2411_v38  ;;  %v254_v43 = vld [vmem:[%s2288_s13 + $0xd8] sm:$0xff]  ;;  %v255_v44 = vld [vmem:[%s2288_s13 + $0xe0] sm:$0xff]  ;;  %v256_v45 = vld [vmem:[%s2288_s13 + $0xe8] sm:$0xff] }
  0x20   : > { %v272_v46 = vpack.c.bf16 %v254_v43, %v253_v42  ;;  %v273_v47 = vpack.c.bf16 %v256_v45, %v255_v44  ;;  %v257_v48 = vld [vmem:[%s2288_s13 + $0xf0] sm:$0xff]  ;;  %v258_v49 = vld [vmem:[%s2288_s13 + $0xf8] sm:$0xff]  ;;  %s2946_s13 = scalar_lea.hbm %s2999_s5, %s1750_s9 }
  0x21   : > { %v274_v50 = vpack.c.bf16 %v258_v49, %v257_v48 }
  0x23   : > { %1020 = vperm.xlu1 %1998, %v2323_v13   ;;  %1015 = vperm.xlu0 %1997, %v2320_v12  }
  0x24   : > { %1891 = vmatmul.mubr.msk.bf16.gmra.mxu0 %vm298_vm0, %v262_v16 }
  0x25   : > { %1894 = vmatprep.mubr.msk.bf16.mxu0 %vm298_vm0, %v263_v17 }
  0x27   : > { %1030 = vperm.xlu1 %1998, %v2330_v15   ;;  %1025 = vperm.xlu0 %1997, %v2327_v14  }
  0x2b   : > { %1040 = vperm.xlu1 %1998, %v2345_v19   ;;  %1035 = vperm.xlu0 %1997, %v2342_v18  }
  0x2c   : > { %1895 = vmatmul.mubr.msk.bf16.gmra.mxu0 %vm298_vm0, %v264_v22 }
  0x2d   : > { %1898 = vmatprep.mubr.msk.bf16.mxu0 %vm298_vm0, %v265_v23 }
  0x2f   : > { %1050 = vperm.xlu1 %1998, %v2352_v21   ;;  %1045 = vperm.xlu0 %1997, %v2349_v20  }
  0x33   : > { %1060 = vperm.xlu1 %1998, %v2367_v25   ;;  %1055 = vperm.xlu0 %1997, %v2364_v24  }
  0x34   : > { %1899 = vmatmul.mubr.msk.bf16.gmra.mxu0 %vm298_vm0, %v266_v28 }
  0x35   : > { %1902 = vmatprep.mubr.msk.bf16.mxu0 %vm298_vm0, %v267_v29 }
  0x37   : > { %1070 = vperm.xlu1 %1998, %v2374_v27   ;;  %1065 = vperm.xlu0 %1997, %v2371_v26  }
  0x3b   : > { %1080 = vperm.xlu1 %1998, %v2389_v31   ;;  %1075 = vperm.xlu0 %1997, %v2386_v30  }
  0x3c   : > { %1903 = vmatmul.mubr.msk.bf16.gmra.mxu0 %vm298_vm0, %v268_v34 }
  0x3d   : > { %1906 = vmatprep.mubr.msk.bf16.mxu0 %vm298_vm0, %v269_v35 }
  0x3f   : > { %1090 = vperm.xlu1 %1998, %v2396_v33   ;;  %1085 = vperm.xlu0 %1997, %v2393_v32  }
  0x43   : > { %1100 = vperm.xlu1 %1998, %v250_v37   ;;  %1095 = vperm.xlu0 %1997, %v249_v36  }
  0x44   : > { %1907 = vmatmul.mubr.msk.bf16.gmra.mxu0 %vm298_vm0, %v270_v40 }
  0x45   : > { %1910 = vmatprep.mubr.msk.bf16.mxu0 %vm298_vm0, %v271_v41 }
  0x47   : > { %1110 = vperm.xlu1 %1998, %v2414_v39   ;;  %1105 = vperm.xlu0 %1997, %v2411_v38  }
  0x4b   : > { %1120 = vperm.xlu1 %1998, %v254_v43   ;;  %1115 = vperm.xlu0 %1997, %v253_v42  }
  0x4c   : > { %1911 = vmatmul.mubr.msk.bf16.gmra.mxu0 %vm298_vm0, %v272_v46 }
  0x4d   : > { %1914 = vmatprep.mubr.msk.bf16.mxu0 %vm298_vm0, %v273_v47 }
  0x4f   : > { %1130 = vperm.xlu1 %1998, %v256_v45   ;;  %1125 = vperm.xlu0 %1997, %v255_v44  }
  0x53   : > { %1140 = vperm.xlu1 %1998, %v258_v49   ;;  %1135 = vperm.xlu0 %1997, %v257_v48  }
  0x54   : > { %1915 = vmatmul.mubr.msk.bf16.gmra.mxu0 %vm298_vm0, %v274_v50 }
  0x57   : > { %2000 = vset.pattern.permute.xlu1 %v2196_v51  ;;  %1999 = vset.pattern.permute.xlu0 %v2196_v51 }
  0x58   : > { %1181 = vperm.xlu1 %2000, %v2294_v4   ;;  %1177 = vperm.xlu0 %1999, %v2291_v3  }
  0x5c   : > { %1185 = vperm.xlu1 %2000, %v2297_v5   ;;  %1189 = vperm.xlu0 %1999, %v2302_v7  }
  0x60   : > { %1193 = vperm.xlu1 %2000, %v2305_v8   ;;  %1197 = vperm.xlu0 %1999, %v2308_v9  }
  0x64   : > { %1201 = vperm.xlu1 %2000, %v2320_v12   ;;  %1205 = vperm.xlu0 %1999, %v2323_v13  }
  0x68   : > { %1209 = vperm.xlu1 %2000, %v2327_v14   ;;  %1213 = vperm.xlu0 %1999, %v2330_v15  }
  0x6c   : > { %1217 = vperm.xlu1 %2000, %v2342_v18   ;;  %1221 = vperm.xlu0 %1999, %v2345_v19  }
  0x70   : > { %1225 = vperm.xlu1 %2000, %v2349_v20   ;;  %1229 = vperm.xlu0 %1999, %v2352_v21  }
  0x74   : > { %1233 = vperm.xlu1 %2000, %v2364_v24   ;;  %1237 = vperm.xlu0 %1999, %v2367_v25  }
  0x78   : > { %1241 = vperm.xlu1 %2000, %v2371_v26   ;;  %1245 = vperm.xlu0 %1999, %v2374_v27  }
  0x7c   : > { %1249 = vperm.xlu1 %2000, %v2386_v30   ;;  %1253 = vperm.xlu0 %1999, %v2389_v31  }
  0x80   : > { %1257 = vperm.xlu1 %2000, %v2393_v32   ;;  %1261 = vperm.xlu0 %1999, %v2396_v33  }
  0x84   : > { %1265 = vperm.xlu1 %2000, %v249_v36   ;;  %1269 = vperm.xlu0 %1999, %v250_v37  }
  0x88   : > { %1273 = vperm.xlu1 %2000, %v2411_v38   ;;  %1277 = vperm.xlu0 %1999, %v2414_v39  }
  0x8c   : > { %1281 = vperm.xlu1 %2000, %v253_v42   ;;  %1285 = vperm.xlu0 %1999, %v254_v43  }
  0x90   : > { %1289 = vperm.xlu1 %2000, %v255_v44   ;;  %1293 = vperm.xlu0 %1999, %v256_v45  }
  0x94   : > { %1297 = vperm.xlu1 %2000, %v257_v48   ;;  %1301 = vperm.xlu0 %1999, %v258_v49  }
  0xdc   : > { %v1888_v55 = vpop.f32.mrf.mxu0 }
  0xdd   : > { %v2470_v56 = vadd.f32 %v1888_v55, %v2467_v54 }
  0xde   : > { %v381_v57 = vpop.f32.mrf.mxu0 }
  0xdf   : > { %v1632_v58 = vmul.f32 -1.442695, %v2470_v56  ;;  %v2474_v59 = vadd.f32 %v2467_v54, %v381_v57 }
  0xe0   : > { %v1889_v60 = vpop.f32.mrf.mxu0 }
  0xe1   : > { %2005 = vpow2.f32 %v1632_v58  ;;  %v1630_v61 = vmul.f32 -1.442695, %v2474_v59  ;;  %v2478_v62 = vadd.f32 %v1889_v60, %v2467_v54 }
  0xe2   : > { %v384_v63 = vpop.f32.mrf.mxu0 }
  0xe3   : > { %2007 = vpow2.f32 %v1630_v61  ;;  %v1633_v0 = vmul.f32 -1.442695, %v2478_v62  ;;  %v2482_v1 = vadd.f32 %v2467_v54, %v384_v63 }
  0xe4   : > { %v1892_v2 = vpop.f32.mrf.mxu0 }
  0xe5   : > { %2009 = vpow2.f32 %v1633_v0  ;;  %v1631_v3 = vmul.f32 -1.442695, %v2482_v1  ;;  %v2486_v4 = vadd.f32 %v1892_v2, %v2467_v54 }
  0xe6   : > { %v397_v5 = vpop.f32.mrf.mxu0 }
  0xe7   : > { %2011 = vpow2.f32 %v1631_v3  ;;  %v1636_v6 = vmul.f32 -1.442695, %v2486_v4  ;;  %v2490_v7 = vadd.f32 %v2467_v54, %v397_v5 }
  0xe8   : > { %v1893_v8 = vpop.f32.mrf.mxu0 }
  0xe9   : > { %2013 = vpow2.f32 %v1636_v6  ;;  %v1634_v9 = vmul.f32 -1.442695, %v2490_v7  ;;  %v2494_v10 = vadd.f32 %v1893_v8, %v2467_v54 }
  0xea   : > { %v400_v11 = vpop.f32.mrf.mxu0 }
  0xeb   : > { %2015 = vpow2.f32 %v1634_v9  ;;  %v1637_v12 = vmul.f32 -1.442695, %v2494_v10  ;;  %v2498_v13 = vadd.f32 %v2467_v54, %v400_v11 }
  0xec   : > { %v1896_v14 = vpop.f32.mrf.mxu0 }
  0xed   : > { %2017 = vpow2.f32 %v1637_v12  ;;  %v1635_v15 = vmul.f32 -1.442695, %v2498_v13  ;;  %v2502_v16 = vadd.f32 %v1896_v14, %v2467_v54 }
  0xee   : > { %v2006_v17 = vpop.eup %2005  ;;  %v413_v18 = vpop.f32.mrf.mxu0 }
  0xef   : > { %v606_v19 = vadd.f32 1.0, %v2006_v17  ;;  %2019 = vpow2.f32 %v1635_v15  ;;  %v1640_v20 = vmul.f32 -1.442695, %v2502_v16  ;;  %v2506_v21 = vadd.f32 %v2467_v54, %v413_v18 }
  0xf0   : > { %v2008_v22 = vpop.eup %2007  ;;  %v1897_v23 = vpop.f32.mrf.mxu0 }
  0xf1   : > { %2021 = vrcp.f32 %v606_v19  ;;  %v604_v24 = vadd.f32 1.0, %v2008_v22  ;;  %v1638_v25 = vmul.f32 -1.442695, %v2506_v21  ;;  %v2510_v26 = vadd.f32 %v1897_v23, %v2467_v54 }
  0xf2   : > { %v2010_v27 = vpop.eup %2009  ;;  %2023 = vpow2.f32 %v1640_v20  ;;  %v416_v28 = vpop.f32.mrf.mxu0 }
  0xf3   : > { %2025 = vrcp.f32 %v604_v24  ;;  %v607_v29 = vadd.f32 1.0, %v2010_v27  ;;  %v1641_v30 = vmul.f32 -1.442695, %v2510_v26  ;;  %v2514_v31 = vadd.f32 %v2467_v54, %v416_v28 }
  0xf4   : > { %v2012_v32 = vpop.eup %2011  ;;  %2027 = vpow2.f32 %v1638_v25  ;;  %v1900_v33 = vpop.f32.mrf.mxu0 }
  0xf5   : > { %2029 = vrcp.f32 %v607_v29  ;;  %v605_v34 = vadd.f32 1.0, %v2012_v32  ;;  %v1639_v35 = vmul.f32 -1.442695, %v2514_v31  ;;  %v2518_v36 = vadd.f32 %v1900_v33, %v2467_v54 }
  0xf6   : > { %v2014_v37 = vpop.eup %2013  ;;  %2031 = vpow2.f32 %v1641_v30  ;;  %v429_v38 = vpop.f32.mrf.mxu0 }
  0xf7   : > { %2033 = vrcp.f32 %v605_v34  ;;  %v610_v39 = vadd.f32 1.0, %v2014_v37  ;;  %v1644_v40 = vmul.f32 -1.442695, %v2518_v36  ;;  %v2522_v41 = vadd.f32 %v2467_v54, %v429_v38 }
  0xf8   : > { %v2016_v42 = vpop.eup %2015  ;;  %2035 = vpow2.f32 %v1639_v35  ;;  %v1901_v43 = vpop.f32.mrf.mxu0 }
  0xf9   : > { %2037 = vrcp.f32 %v610_v39  ;;  %v608_v44 = vadd.f32 1.0, %v2016_v42  ;;  %v1642_v45 = vmul.f32 -1.442695, %v2522_v41  ;;  %v2526_v46 = vadd.f32 %v1901_v43, %v2467_v54 }
  0xfa   : > { %v2018_v47 = vpop.eup %2017  ;;  %2039 = vpow2.f32 %v1644_v40  ;;  %v432_v48 = vpop.f32.mrf.mxu0 }
  0xfb   : > { %2041 = vrcp.f32 %v608_v44  ;;  %v611_v49 = vadd.f32 1.0, %v2018_v47  ;;  %v1645_v50 = vmul.f32 -1.442695, %v2526_v46  ;;  %v2530_v51 = vadd.f32 %v2467_v54, %v432_v48 }
  0xfc   : > { %v2020_v52 = vpop.eup %2019  ;;  %2043 = vpow2.f32 %v1642_v45  ;;  %v1904_v53 = vpop.f32.mrf.mxu0 }
  0xfd   : > { %2045 = vrcp.f32 %v611_v49  ;;  %v609_v55 = vadd.f32 1.0, %v2020_v52  ;;  %v1643_v57 = vmul.f32 -1.442695, %v2530_v51  ;;  %v2534_v58 = vadd.f32 %v1904_v53, %v2467_v54 }
  0xfe   : > { %v2022_v60 = vpop.eup %2021  ;;  %2047 = vpow2.f32 %v1645_v50  ;;  %v445_v61 = vpop.f32.mrf.mxu0 }
  0xff   : > { %v2024_v63 = vpop.eup %2023  ;;  %2049 = vrcp.f32 %v609_v55  ;;  %v1648_v0 = vmul.f32 -1.442695, %v2534_v58  ;;  %v2538_v2 = vadd.f32 %v2467_v54, %v445_v61  ;;  %v702_v32 = vmul.f32 %v2022_v60, %v2470_v56 }
 0x100   : > { %v2026_v3 = vpop.eup %2025  ;;  %v614_v5 = vadd.f32 1.0, %v2024_v63  ;;  %2051 = vpow2.f32 %v1643_v57  ;;  %v1905_v6 = vpop.f32.mrf.mxu0 }
 0x101   : > { %v2028_v8 = vpop.eup %2027  ;;  %2053 = vpow2.f32 %v1648_v0  ;;  %v1646_v9 = vmul.f32 -1.442695, %v2538_v2  ;;  %v2542_v11 = vadd.f32 %v1905_v6, %v2467_v54  ;;  %v700_v27 = vmul.f32 %v2026_v3, %v2474_v59 }
 0x102   : > { %v2030_v12 = vpop.eup %2029  ;;  %2055 = vrcp.f32 %v614_v5  ;;  %v612_v14 = vadd.f32 1.0, %v2028_v8  ;;  %v448_v15 = vpop.f32.mrf.mxu0 }
 0x103   : > { %v2032_v17 = vpop.eup %2031  ;;  %2057 = vpow2.f32 %v1646_v9  ;;  %v1649_v18 = vmul.f32 -1.442695, %v2542_v11  ;;  %v2546_v19 = vadd.f32 %v2467_v54, %v448_v15  ;;  %v703_v22 = vmul.f32 %v2030_v12, %v2478_v62 }
 0x104   : > { %v2034_v20 = vpop.eup %2033  ;;  %2059 = vrcp.f32 %v612_v14  ;;  %v615_v23 = vadd.f32 1.0, %v2032_v17  ;;  %v1908_v24 = vpop.f32.mrf.mxu0 }
 0x105   : > { %v2036_v25 = vpop.eup %2035  ;;  %v701_v28 = vmul.f32 %v2034_v20, %v2482_v1  ;;  %2061 = vpow2.f32 %v1649_v18  ;;  %v1647_v29 = vmul.f32 -1.442695, %v2546_v19  ;;  %v2554_v34 = vadd.f32 %v1908_v24, %v2467_v54 }
 0x106   : > { %v2038_v30 = vpop.eup %2037  ;;  %2063 = vrcp.f32 %v615_v23  ;;  %v613_v33 = vadd.f32 1.0, %v2036_v25  ;;  %v461_v62 = vpop.f32.mrf.mxu0  ;;  %v733_v1 = vpack.c.bf16 %v703_v22, %v702_v32 }
 0x107   : > { %v2040_v35 = vpop.eup %2039  ;;  %2065 = vpow2.f32 %v1647_v29  ;;  %v2557_v37 = vadd.f32 %v2467_v54, %v461_v62  ;;  %v732_v59 = vpack.c.bf16 %v701_v28, %v700_v27  ;;  %v1652_v40 = vmul.f32 -1.442695, %v2554_v34 }
 0x108   : > { %v2042_v38 = vpop.eup %2041  ;;  %2067 = vrcp.f32 %v613_v33  ;;  %v618_v39 = vadd.f32 1.0, %v2040_v35  ;;  %v1909_v42 = vpop.f32.mrf.mxu0  ;;  %v706_v63 = vmul.f32 %v2038_v30, %v2486_v4 }
 0x109   : > { %v2044_v56 = vpop.eup %2043  ;;  %v1650_v43 = vmul.f32 -1.442695, %v2557_v37  ;;  %v2562_v44 = vadd.f32 %v1909_v42, %v2467_v54  ;;  %1922 = vmatprep.mubr.msk.bf16.mxu1 %vm298_vm0, %v732_v59  ;;  %v704_v0 = vmul.f32 %v2042_v38, %v2490_v7 }
 0x10a   : > { %v2046_v45 = vpop.eup %2045  ;;  %2069 = vrcp.f32 %v618_v39  ;;  %v616_v47 = vadd.f32 1.0, %v2044_v56  ;;  %v464_v48 = vpop.f32.mrf.mxu0  ;;  %1923 = vmatmul.mubr.msk.bf16.vlgmr.msra.gmra.mxu1 %vm298_vm0, %v733_v1 }
 0x10b   : > { %v2048_v49 = vpop.eup %2047  ;;  %2071 = vpow2.f32 %v1652_v40  ;;  %v1653_v50 = vmul.f32 -1.442695, %v2562_v44  ;;  %v2568_v52 = vadd.f32 %v2467_v54, %v464_v48  ;;  %v707_v55 = vmul.f32 %v2046_v45, %v2494_v10 }
 0x10c   : > { %v2050_v53 = vpop.eup %2049  ;;  %2073 = vrcp.f32 %v616_v47  ;;  %v619_v57 = vadd.f32 1.0, %v2048_v49  ;;  %v1912_v60 = vpop.f32.mrf.mxu0 }
 0x10d   : > { %v2052_v61 = vpop.eup %2051  ;;  %v705_v3 = vmul.f32 %v2050_v53, %v2498_v13  ;;  %2075 = vpow2.f32 %v1650_v43  ;;  %v1651_v8 = vmul.f32 -1.442695, %v2568_v52  ;;  %v2576_v9 = vadd.f32 %v1912_v60, %v2467_v54 }
 0x10e   : > { %v2054_v5 = vpop.eup %2053  ;;  %2077 = vrcp.f32 %v619_v57  ;;  %v617_v6 = vadd.f32 1.0, %v2052_v61  ;;  %v477_v10 = vpop.f32.mrf.mxu0  ;;  %v735_v17 = vpack.c.bf16 %v707_v55, %v706_v63 }
 0x10f   : > { %v2056_v12 = vpop.eup %2055  ;;  %v734_v14 = vpack.c.bf16 %v705_v3, %v704_v0  ;;  %v622_v15 = vadd.f32 1.0, %v2054_v5  ;;  %2079 = vpow2.f32 %v1653_v50  ;;  %v2579_v4 = vadd.f32 %v2467_v54, %v477_v10 }
 0x110   : > { %v2058_v7 = vpop.eup %2057  ;;  %2081 = vrcp.f32 %v617_v6  ;;  %v1656_v13 = vmul.f32 -1.442695, %v2576_v9  ;;  %v1913_v18 = vpop.f32.mrf.mxu0 }
 0x111   : > { %v2060_v20 = vpop.eup %2059  ;;  %2083 = vrcp.f32 %v622_v15  ;;  %v620_v22 = vadd.f32 1.0, %v2058_v7  ;;  %v2583_v23 = vadd.f32 %v1913_v18, %v2467_v54  ;;  %1926 = vmatprep.mubr.msk.bf16.mxu1 %vm298_vm0, %v734_v14  ;;  %v1654_v25 = vmul.f32 -1.442695, %v2579_v4 }
 0x112   : > { %v2062_v24 = vpop.eup %2061  ;;  %2085 = vpow2.f32 %v1651_v8  ;;  %v480_v27 = vpop.f32.mrf.mxu0  ;;  %1927 = vmatmul.mubr.msk.bf16.gmra.mxu1 %vm298_vm0, %v735_v17  ;;  %v708_v40 = vmul.f32 %v2060_v20, %v2506_v21 }
 0x113   : > { %v2064_v28 = vpop.eup %2063  ;;  %2087 = vrcp.f32 %v620_v22  ;;  %v623_v29 = vadd.f32 1.0, %v2062_v24  ;;  %v2589_v30 = vadd.f32 %v2467_v54, %v480_v27  ;;  %v1657_v62 = vmul.f32 -1.442695, %v2583_v23 }
 0x114   : > { %v2066_v32 = vpop.eup %2065  ;;  %v711_v33 = vmul.f32 %v2064_v28, %v2510_v26  ;;  %2089 = vpow2.f32 %v1656_v13  ;;  %v1916_v35 = vpop.f32.mrf.mxu0  ;;  %v710_v26 = vmul.f32 %v2056_v12, %v2502_v16 }
 0x115   : > { %v2068_v59 = vpop.eup %2067  ;;  %2091 = vrcp.f32 %v623_v29  ;;  %v621_v38 = vadd.f32 1.0, %v2066_v32  ;;  %v1655_v1 = vmul.f32 -1.442695, %v2589_v30  ;;  %v2595_v39 = vadd.f32 %v1916_v35, %v2467_v54 }
 0x116   : > { %v709_v42 = vmul.f32 %v2068_v59, %v2514_v31  ;;  %2093 = vpow2.f32 %v1654_v25  ;;  %v493_v56 = vpop.f32.mrf.mxu0  ;;  %v737_v55 = vpack.c.bf16 %v711_v33, %v710_v26 }
 0x117   : > { %v2070_v43 = vpop.eup %2069  ;;  %2095 = vrcp.f32 %v621_v38  ;;  %v1660_v45 = vmul.f32 -1.442695, %v2595_v39  ;;  %v2602_v47 = vadd.f32 %v2467_v54, %v493_v56 }
 0x118   : > { %v2072_v48 = vpop.eup %2071  ;;  %v736_v49 = vpack.c.bf16 %v709_v42, %v708_v40  ;;  %2097 = vpow2.f32 %v1657_v62  ;;  %v1917_v50 = vpop.f32.mrf.mxu0  ;;  %v714_v17 = vmul.f32 %v2070_v43, %v2518_v36 }
 0x119   : > { %v2074_v53 = vpop.eup %2073  ;;  %2099 = vpow2.f32 %v1655_v1  ;;  %v1658_v21 = vmul.f32 -1.442695, %v2602_v47  ;;  %v2606_v31 = vadd.f32 %v1917_v50, %v2467_v54  ;;  %v626_v5 = vadd.f32 1.0, %v2072_v48 }
 0x11a   : > { %v2076_v57 = vpop.eup %2075  ;;  %1930 = vmatprep.mubr.msk.bf16.mxu1 %vm298_vm0, %v736_v49  ;;  %v496_v16 = vpop.f32.mrf.mxu0  ;;  %2101 = vpow2.f32 %v1660_v45  ;;  %v712_v15 = vmul.f32 %v2074_v53, %v2522_v41 }
 0x11b   : > { %v2078_v60 = vpop.eup %2077  ;;  %v624_v61 = vadd.f32 1.0, %v2076_v57  ;;  %v1661_v63 = vmul.f32 -1.442695, %v2606_v31  ;;  %v2611_v0 = vadd.f32 %v2467_v54, %v496_v16  ;;  %1931 = vmatmul.mubr.msk.bf16.gmra.mxu1 %vm298_vm0, %v737_v55  ;;  %2103 = vpow2.f32 %v1658_v21 }
 0x11c   : > { %v2080_v3 = vpop.eup %2079  ;;  %v715_v8 = vmul.f32 %v2078_v60, %v2526_v46 }
 0x11d   : > { %v2082_v6 = vpop.eup %2081  ;;  %2105 = vrcp.f32 %v624_v61  ;;  %v627_v10 = vadd.f32 1.0, %v2080_v3  ;;  %v1659_v12 = vmul.f32 -1.442695, %v2611_v0 }
 0x11e   : > { %v2084_v14 = vpop.eup %2083  ;;  %v713_v7 = vmul.f32 %v2082_v6, %v2530_v51  ;;  %2107 = vpow2.f32 %v1661_v63  ;;  %v739_v46 = vpack.c.bf16 %v715_v8, %v714_v17  ;;  %v986_v17 = vpop.permute.xlu0 %985 }
 0x11f   : > { %v2086_v54 = vpop.eup %2085  ;;  %2109 = vrcp.f32 %v627_v10  ;;  %v718_v35 = vmul.f32 %v2084_v14, %v2534_v58 }
 0x120   : > { %v2088_v13 = vpop.eup %2087  ;;  %v738_v18 = vpack.c.bf16 %v713_v7, %v712_v15  ;;  %v625_v20 = vadd.f32 1.0, %v2086_v54  ;;  %2111 = vpow2.f32 %v1659_v12  ;;  %v996_v54 = vpop.permute.xlu1 %995 }
 0x121   : > { %v2090_v22 = vpop.eup %2089  ;;  %2113 = vrcp.f32 %v626_v5  ;;  %v716_v36 = vmul.f32 %v2088_v13, %v2538_v2 }
 0x122   : > { %v2092_v24 = vpop.eup %2091  ;;  %2115 = vrcp.f32 %v625_v20  ;;  %v630_v25 = vadd.f32 1.0, %v2090_v22  ;;  %1934 = vmatprep.mubr.msk.bf16.mxu1 %vm298_vm0, %v738_v18  ;;  %v991_v18 = vpop.permute.xlu0 %990 }
 0x123   : > { %v2094_v41 = vpop.eup %2093  ;;  %1935 = vmatmul.mubr.msk.bf16.gmra.mxu1 %vm298_vm0, %v739_v46  ;;  %v719_v29 = vmul.f32 %v2092_v24, %v2542_v11 }
 0x124   : > { %v2096_v51 = vpop.eup %2095  ;;  %v628_v27 = vadd.f32 1.0, %v2094_v41  ;;  %2117 = vrcp.f32 %v630_v25  ;;  %v1001_v13 = vpop.permute.xlu1 %1000 }
 0x125   : > { %v2098_v28 = vpop.eup %2097  ;;  %v717_v32 = vmul.f32 %v2096_v51, %v2546_v19  ;;  %v741_v42 = vpack.c.bf16 %v719_v29, %v718_v35 }
 0x126   : > { %v2100_v33 = vpop.eup %2099  ;;  %v631_v62 = vadd.f32 1.0, %v2098_v28  ;;  %2119 = vrcp.f32 %v628_v27  ;;  %v2647_v22 = vpop.permute.xlu0 %1005 }
 0x127   : > { %v740_v59 = vpack.c.bf16 %v717_v32, %v716_v36  ;;  %v629_v38 = vadd.f32 1.0, %v2100_v33  ;;  %v2102_v1 = vpop.eup %2101 }
 0x128   : > { %2121 = vrcp.f32 %v631_v62  ;;  %v2104_v40 = vpop.eup %2103  ;;  %v634_v45 = vadd.f32 1.0, %v2102_v1  ;;  %v2645_v20 = vpop.permute.xlu1 %1010 }
 0x129   : > { %2123 = vrcp.f32 %v629_v38  ;;  %1938 = vmatprep.mubr.msk.bf16.mxu1 %vm298_vm0, %v740_v59  ;;  %v632_v56 = vadd.f32 1.0, %v2104_v40 }
 0x12a   : > { %v2106_v2 = vpop.eup %2105 }
 0x12b   : > { %v2108_v11 = vpop.eup %2107  ;;  %1939 = vmatmul.mubr.msk.bf16.gmra.mxu1 %vm298_vm0, %v741_v42  ;;  %2125 = vrcp.f32 %v632_v56  ;;  %v720_v53 = vmul.f32 %v2106_v2, %v2557_v37 }
 0x12c   : > { %v2110_v19 = vpop.eup %2109  ;;  %v635_v43 = vadd.f32 1.0, %v2108_v11 }
 0x12d   : > { %v2112_v26 = vpop.eup %2111  ;;  %v723_v50 = vmul.f32 %v2110_v19, %v2562_v44 }
 0x12e   : > { %v2114_v58 = vpop.eup %2113  ;;  %v633_v48 = vadd.f32 1.0, %v2112_v26  ;;  %2127 = vrcp.f32 %v635_v43 }
 0x12f   : > { %v2116_v49 = vpop.eup %2115  ;;  %v722_v21 = vmul.f32 %v2114_v58, %v2554_v34 }
 0x130   : > { %v721_v55 = vmul.f32 %v2116_v49, %v2568_v52  ;;  %2129 = vrcp.f32 %v633_v48 }
 0x131   : > { %2131 = vrcp.f32 %v634_v45  ;;  %v2118_v16 = vpop.eup %2117  ;;  %v743_v60 = vpack.c.bf16 %v723_v50, %v722_v21 }
 0x132   : > { %v742_v57 = vpack.c.bf16 %v721_v55, %v720_v53  ;;  %v726_v5 = vmul.f32 %v2118_v16, %v2576_v9  ;;  %v980_v55 = vlaneseq }
 0x133   : > { %v2120_v61 = vpop.eup %2119 }
 0x134   : > { %1942 = vmatprep.mubr.msk.bf16.mxu1 %vm298_vm0, %v742_v57  ;;  %v724_v44 = vmul.f32 %v2120_v61, %v2579_v4  ;;  %v2703_v57 = vand.u32 127, %v980_v55  ;;  %v2711_v61 = vld [vmem:[%s2998_s4] ss:$0 sm:$0xff] }
 0x135   : > { %v2122_v63 = vpop.eup %2121  ;;  %1943 = vmatmul.mubr.msk.bf16.gmra.mxu1 %vm298_vm0, %v743_v60 }
 0x136   : > { %v2124_v3 = vpop.eup %2123  ;;  %v727_v37 = vmul.f32 %v2122_v63, %v2583_v23  ;;  %vm982_vm1 = vcmp.eq.s32.totalorder %v2703_v57, 0  ;;  %vm1175_vm2 = vcmp.eq.s32.totalorder %v2703_v57, 1 }
 0x137   : > { %v725_v52 = vmul.f32 %v2124_v3, %v2589_v30 }
 0x138   : > { %v2126_v6 = vpop.eup %2125  ;;  %v745_v8 = vpack.c.bf16 %v727_v37, %v726_v5  ;;  %v1145_v37 = vsel %vm982_vm1, %v996_v54, 0.0 }
 0x139   : > { %v744_v34 = vpack.c.bf16 %v725_v52, %v724_v44  ;;  %v728_v15 = vmul.f32 %v2126_v6, %v2602_v47  ;;  %v2649_v47 = vpop.permute.xlu1 %1020  ;;  %v1146_v52 = vsel %vm982_vm1, %v1001_v13, 0.0  ;;  %v1143_v6 = vsel %vm982_vm1, %v986_v17, 0.0 }
 0x13b   : > { %1946 = vmatprep.mubr.msk.bf16.mxu1 %vm298_vm0, %v744_v34  ;;  %v2128_v10 = vpop.eup %2127 }
 0x13c   : > { %v731_v23 = vmul.f32 %v2128_v10, %v2606_v31 }
 0x13d   : > { %v2130_v12 = vpop.eup %2129  ;;  %1947 = vmatmul.mubr.msk.bf16.gmra.mxu1 %vm298_vm0, %v745_v8  ;;  %v2653_v31 = vpop.permute.xlu1 %1030  ;;  %v1144_v8 = vsel %vm982_vm1, %v991_v18, 0.0 }
 0x13e   : > { %v2132_v14 = vpop.eup %2131  ;;  %v729_v4 = vmul.f32 %v2130_v12, %v2611_v0  ;;  %v2651_v0 = vpop.permute.xlu0 %1015 }
 0x13f   : > { %v730_v30 = vmul.f32 %v2132_v14, %v2595_v39 }
 0x140   : > { %v746_v7 = vpack.c.bf16 %v729_v4, %v728_v15 }
 0x141   : > { %v747_v9 = vpack.c.bf16 %v731_v23, %v730_v30  ;;  %v2657_v46 = vpop.permute.xlu1 %1040 }
 0x142   : > { %1950 = vmatprep.mubr.msk.bf16.mxu1 %vm298_vm0, %v746_v7  ;;  %v2655_v39 = vpop.permute.xlu0 %1025 }
 0x145   : > { %1951 = vmatmul.mubr.msk.bf16.gmra.mxu1 %vm298_vm0, %v747_v9  ;;  %v2661_v25 = vpop.permute.xlu1 %1050 }
 0x146   : > { %v2659_v24 = vpop.permute.xlu0 %1035 }
 0x149   : > { %v2665_v51 = vpop.permute.xlu1 %1060 }
 0x14a   : > { %v2663_v41 = vpop.permute.xlu0 %1045 }
 0x14d   : > { %v2669_v28 = vpop.permute.xlu1 %1070 }
 0x14e   : > { %v2667_v27 = vpop.permute.xlu0 %1055 }
 0x151   : > { %v2673_v29 = vpop.permute.xlu1 %1080 }
 0x152   : > { %v2671_v36 = vpop.permute.xlu0 %1065 }
 0x155   : > { %v2677_v33 = vpop.permute.xlu1 %1090 }
 0x156   : > { %v2675_v32 = vpop.permute.xlu0 %1075 }
 0x159   : > { %v2681_v35 = vpop.permute.xlu1 %1100 }
 0x15a   : > { %v2679_v62 = vpop.permute.xlu0 %1085 }
 0x15d   : > { %v2685_v38 = vpop.permute.xlu1 %1110 }
 0x15e   : > { %v2683_v59 = vpop.permute.xlu0 %1095 }
 0x161   : > { %v2689_v40 = vpop.permute.xlu1 %1120 }
 0x162   : > { %v2687_v1 = vpop.permute.xlu0 %1105 }
 0x165   : > { %v2693_v2 = vpop.permute.xlu1 %1130 }
 0x166   : > { %v2691_v42 = vpop.permute.xlu0 %1115 }
 0x169   : > { %v2697_v11 = vpop.permute.xlu1 %1140 }
 0x16a   : > { %v2695_v56 = vpop.permute.xlu0 %1125 }
 0x16d   : > { %v1182_v43 = vpop.permute.xlu1 %1181 }
 0x16e   : > { %v2699_v19 = vpop.permute.xlu0 %1135  ;;  %v1305_v54 = vsel %vm1175_vm2, %v1182_v43, %v1144_v8 }
 0x171   : > { %v1186_v45 = vpop.permute.xlu1 %1185 }
 0x172   : > { %v1178_v26 = vpop.permute.xlu0 %1177  ;;  %v1306_v14 = vsel %vm1175_vm2, %v1186_v45, %v1145_v37  ;;  %v1149_v37 = vsel %vm982_vm1, %v2651_v0, 0.0 }
 0x173   : > { %v1304_v17 = vsel %vm1175_vm2, %v1178_v26, %v1143_v6 }
 0x175   : > { %v1194_v48 = vpop.permute.xlu1 %1193 }
 0x176   : > { %v1190_v58 = vpop.permute.xlu0 %1189 }
 0x177   : > { %v1307_v15 = vsel %vm1175_vm2, %v1190_v58, %v1146_v52 }
 0x179   : > { %v1202_v50 = vpop.permute.xlu1 %1201 }
 0x17a   : > { %v1198_v49 = vpop.permute.xlu0 %1197  ;;  %v1310_v8 = vsel %vm1175_vm2, %v1202_v50, %v1149_v37 }
 0x17d   : > { %v2701_v21 = vpop.permute.xlu1 %1209 }
 0x17e   : > { %v1206_v53 = vpop.permute.xlu0 %1205 }
 0x181   : > { %v2713_v63 = vpop.permute.xlu1 %1217 }
 0x182   : > { %v2705_v16 = vpop.permute.xlu0 %1213 }
 0x185   : > { %v2736_v23 = vpop.permute.xlu1 %1225 }
 0x186   : > { %v2715_v3 = vpop.permute.xlu0 %1221 }
 0x18a   : > { %v2743_v13 = vpop.permute.xlu0 %1229 }
 0x1ca   : > { %v1924_v60 = vpop.f32.mrf.mxu1 }
 0x1cb   : > { %v862_v5 = vadd.f32 %v1924_v60, %v2711_v61 }
 0x1cc   : > { %v853_v44 = vpop.f32.mrf.mxu1 }
 0x1cd   : > { %v854_v10 = vadd.f32 %v2711_v61, %v853_v44  ;;  %v1338_v7 = vadd.f32 %v1306_v14, %v862_v5  ;;  %v1150_v44 = vsel %vm982_vm1, %v2649_v47, 0.0  ;;  %v1148_v5 = vsel %vm982_vm1, %v2645_v20, 0.0 }
 0x1ce   : > { %v1925_v34 = vpop.f32.mrf.mxu1  ;;  %v1147_v47 = vsel %vm982_vm1, %v2647_v22, 0.0 }
 0x1cf   : > { %v865_v12 = vadd.f32 %v1925_v34, %v2711_v61  ;;  %v1336_v45 = vadd.f32 %v1304_v17, %v854_v10  ;;  %v1234_v34 = vpop.permute.xlu1 %1233  ;;  %v1311_v10 = vsel %vm1175_vm2, %v1206_v53, %v1150_v44 }
 0x1d0   : > { %v856_v4 = vpop.f32.mrf.mxu1 }
 0x1d1   : > { %v1339_v30 = vadd.f32 %v1307_v15, %v865_v12  ;;  %v857_v9 = vadd.f32 %v2711_v61, %v856_v4  ;;  %v1238_v12 = vpop.permute.xlu0 %1237  ;;  %v1308_v4 = vsel %vm1175_vm2, %v1194_v48, %v1147_v47 }
 0x1d2   : > { %v1928_v18 = vpop.f32.mrf.mxu1 }
 0x1d3   : > { %v1759_v55 = vpack.c.bf16 %v1339_v30, %v1338_v7  ;;  %v1337_v60 = vadd.f32 %v1305_v54, %v857_v9  ;;  %v878_v26 = vadd.f32 %v1928_v18, %v2711_v61  ;;  %v1309_v7 = vsel %vm1175_vm2, %v1198_v49, %v1148_v5 }
 0x1d4   : > { %v869_v58 = vpop.f32.mrf.mxu1  ;;  %v1154_v18 = vsel %vm982_vm1, %v2657_v46, 0.0  ;;  %v1151_v46 = vsel %vm982_vm1, %v2655_v39, 0.0 }
 0x1d5   : > { %1831 = vst [vmem:[%s2751_s8 + $0x8] sm:$0xff] %v1759_v55   ;;  %v1754_v43 = vpack.c.bf16 %v1337_v60, %v1336_v45  ;;  %v870_v0 = vadd.f32 %v2711_v61, %v869_v58  ;;  %v1342_v20 = vadd.f32 %v1310_v8, %v878_v26  ;;  %v1153_v45 = vsel %vm982_vm1, %v2659_v24, 0.0  ;;  %v2780_v55 = vpop.permute.xlu1 %1241  ;;  %v2782_v48 = vpop.permute.xlu0 %1245 }
 0x1d6   : > { %v1929_v52 = vpop.f32.mrf.mxu1  ;;  %v1152_v58 = vsel %vm982_vm1, %v2653_v31, 0.0  ;;  %v1314_v37 = vsel %vm1175_vm2, %v2713_v63, %v1153_v45  ;;  %v1312_v39 = vsel %vm1175_vm2, %v2701_v21, %v1151_v46  ;;  %v1157_v21 = vsel %vm982_vm1, %v2667_v27, 0.0 }
 0x1d7   : > { %1755 = vst [vmem:[%s2751_s8] sm:$0xff] %v1754_v43   ;;  %v881_v6 = vadd.f32 %v1929_v52, %v2711_v61  ;;  %v1340_v30 = vadd.f32 %v1308_v4, %v870_v0  ;;  %v1315_v43 = vsel %vm1175_vm2, %v2715_v3, %v1154_v18  ;;  %v1313_v47 = vsel %vm1175_vm2, %v2705_v16, %v1152_v58 }
 0x1d8   : > { %v872_v14 = vpop.f32.mrf.mxu1  ;;  %v1156_v4 = vsel %vm982_vm1, %v2661_v25, 0.0  ;;  %v1318_v27 = vsel %vm1175_vm2, %v1234_v34, %v1157_v21  ;;  %v1162_v46 = vsel %vm982_vm1, %v2673_v29, 0.0 }
 0x1d9   : > { %v1343_v15 = vadd.f32 %v1311_v10, %v881_v6  ;;  %v873_v22 = vadd.f32 %v2711_v61, %v872_v14  ;;  %v1250_v0 = vpop.permute.xlu1 %1249  ;;  %v1254_v6 = vpop.permute.xlu0 %1253  ;;  %v1317_v45 = vsel %vm1175_vm2, %v2743_v13, %v1156_v4  ;;  %v1160_v13 = vsel %vm982_vm1, %v2669_v28, 0.0 }
 0x1da   : > { %v1164_v4 = vsel %vm982_vm1, %v2677_v33, 0.0 }
 0x1db   : > { %v1769_v9 = vpack.c.bf16 %v1343_v15, %v1342_v20  ;;  %v1341_v54 = vadd.f32 %v1309_v7, %v873_v22  ;;  %v1932_v50 = vpop.f32.mrf.mxu1  ;;  %v1158_v20 = vsel %vm982_vm1, %v2665_v51, 0.0  ;;  %v1155_v7 = vsel %vm982_vm1, %v2663_v41, 0.0 }
 0x1dc   : > { %v894_v49 = vadd.f32 %v1932_v50, %v2711_v61  ;;  %v1316_v41 = vsel %vm1175_vm2, %v2736_v23, %v1155_v7  ;;  %v1163_v7 = vsel %vm982_vm1, %v2679_v62, 0.0 }
 0x1dd   : > { %1833 = vst [vmem:[%s2751_s8 + $0x18] sm:$0xff] %v1769_v9   ;;  %v1764_v17 = vpack.c.bf16 %v1341_v54, %v1340_v30  ;;  %v885_v53 = vpop.f32.mrf.mxu1  ;;  %v1319_v9 = vsel %vm1175_vm2, %v1238_v12, %v1158_v20  ;;  %v1258_v50 = vpop.permute.xlu1 %1257 }
 0x1de   : > { %v886_v44 = vadd.f32 %v2711_v61, %v885_v53  ;;  %v1346_v52 = vadd.f32 %v1314_v37, %v894_v49  ;;  %v1324_v62 = vsel %vm1175_vm2, %v1258_v50, %v1163_v7 }
 0x1df   : > { %1832 = vst [vmem:[%s2751_s8 + $0x10] sm:$0xff] %v1764_v17   ;;  %v1933_v60 = vpop.f32.mrf.mxu1  ;;  %v1262_v17 = vpop.permute.xlu0 %1261 }
 0x1e0   : > { %v897_v24 = vadd.f32 %v1933_v60, %v2711_v61  ;;  %v1344_v8 = vadd.f32 %v1312_v39, %v886_v44  ;;  %v1161_v44 = vsel %vm982_vm1, %v2675_v32, 0.0 }
 0x1e1   : > { %v888_v26 = vpop.f32.mrf.mxu1 }
 0x1e2   : > { %v1347_v31 = vadd.f32 %v1315_v43, %v897_v24  ;;  %v889_v5 = vadd.f32 %v2711_v61, %v888_v26  ;;  %v1159_v43 = vsel %vm982_vm1, %v2671_v36, 0.0  ;;  %v1266_v26 = vpop.permute.xlu1 %1265 }
 0x1e3   : > { %v1936_v63 = vpop.f32.mrf.mxu1 }
 0x1e4   : > { %v1779_v3 = vpack.c.bf16 %v1347_v31, %v1346_v52  ;;  %v1345_v10 = vadd.f32 %v1313_v47, %v889_v5  ;;  %v910_v16 = vadd.f32 %v1936_v63, %v2711_v61  ;;  %v1270_v52 = vpop.permute.xlu0 %1269  ;;  %v1322_v31 = vsel %vm1175_vm2, %v1250_v0, %v1161_v44 }
 0x1e5   : > { %v901_v14 = vpop.f32.mrf.mxu1  ;;  %v1323_v5 = vsel %vm1175_vm2, %v1254_v6, %v1162_v46  ;;  %v1320_v63 = vsel %vm1175_vm2, %v2780_v55, %v1159_v43  ;;  %v1165_v55 = vsel %vm982_vm1, %v2683_v59, 0.0 }
 0x1e6   : > { %1835 = vst [vmem:[%s2751_s8 + $0x28] sm:$0xff] %v1779_v3   ;;  %v1774_v15 = vpack.c.bf16 %v1345_v10, %v1344_v8  ;;  %v902_v51 = vadd.f32 %v2711_v61, %v901_v14  ;;  %v1350_v25 = vadd.f32 %v1318_v27, %v910_v16  ;;  %v1321_v8 = vsel %vm1175_vm2, %v2782_v48, %v1160_v13  ;;  %v1274_v20 = vpop.permute.xlu1 %1273 }
 0x1e7   : > { %v1937_v22 = vpop.f32.mrf.mxu1  ;;  %v1166_v16 = vsel %vm982_vm1, %v2681_v35, 0.0 }
 0x1e8   : > { %1834 = vst [vmem:[%s2751_s8 + $0x20] sm:$0xff] %v1774_v15   ;;  %v913_v30 = vadd.f32 %v1937_v22, %v2711_v61  ;;  %v1348_v49 = vadd.f32 %v1316_v41, %v902_v51  ;;  %v1278_v6 = vpop.permute.xlu0 %1277  ;;  %v1327_v59 = vsel %vm1175_vm2, %v1270_v52, %v1166_v16 }
 0x1e9   : > { %v904_v54 = vpop.f32.mrf.mxu1 }
 0x1ea   : > { %v1351_v53 = vadd.f32 %v1319_v9, %v913_v30  ;;  %v905_v18 = vadd.f32 %v2711_v61, %v904_v54  ;;  %v1326_v30 = vsel %vm1175_vm2, %v1266_v26, %v1165_v55  ;;  %v1282_v9 = vpop.permute.xlu1 %1281 }
 0x1eb   : > { %v1940_v34 = vpop.f32.mrf.mxu1 }
 0x1ec   : > { %v1789_v12 = vpack.c.bf16 %v1351_v53, %v1350_v25  ;;  %v1349_v60 = vadd.f32 %v1317_v45, %v905_v18  ;;  %v926_v24 = vadd.f32 %v1940_v34, %v2711_v61  ;;  %v1286_v54 = vpop.permute.xlu0 %1285  ;;  %v1325_v18 = vsel %vm1175_vm2, %v1262_v17, %v1164_v4 }
 0x1ed   : > { %v917_v58 = vpop.f32.mrf.mxu1  ;;  %v1168_v17 = vsel %vm982_vm1, %v2685_v38, 0.0 }
 0x1ee   : > { %1837 = vst [vmem:[%s2751_s8 + $0x38] sm:$0xff] %v1789_v12   ;;  %v1784_v23 = vpack.c.bf16 %v1349_v60, %v1348_v49  ;;  %v918_v29 = vadd.f32 %v2711_v61, %v917_v58  ;;  %v1354_v28 = vadd.f32 %v1322_v31, %v926_v24  ;;  %v1170_v60 = vsel %vm982_vm1, %v2689_v40, 0.0  ;;  %v1290_v24 = vpop.permute.xlu1 %1289 }
 0x1ef   : > { %v1941_v37 = vpop.f32.mrf.mxu1  ;;  %v1169_v58 = vsel %vm982_vm1, %v2691_v42, 0.0  ;;  %v1331_v43 = vsel %vm1175_vm2, %v1286_v54, %v1170_v60 }
 0x1f0   : > { %1836 = vst [vmem:[%s2751_s8 + $0x30] sm:$0xff] %v1784_v23   ;;  %v929_v32 = vadd.f32 %v1941_v37, %v2711_v61  ;;  %v1352_v3 = vadd.f32 %v1320_v63, %v918_v29  ;;  %v1167_v23 = vsel %vm982_vm1, %v2687_v1, 0.0  ;;  %v1294_v37 = vpop.permute.xlu0 %1293  ;;  %v1330_v13 = vsel %vm1175_vm2, %v1282_v9, %v1169_v58 }
 0x1f1   : > { %v920_v39 = vpop.f32.mrf.mxu1  ;;  %v1328_v1 = vsel %vm1175_vm2, %v1274_v20, %v1167_v23  ;;  %v1173_v63 = vsel %vm982_vm1, %v2699_v19, 0.0  ;;  %v1172_v20 = vsel %vm982_vm1, %v2693_v2, 0.0 }
 0x1f2   : > { %v1355_v47 = vadd.f32 %v1323_v5, %v929_v32  ;;  %v921_v36 = vadd.f32 %v2711_v61, %v920_v39  ;;  %v1329_v32 = vsel %vm1175_vm2, %v1278_v6, %v1168_v17 }
 0x1f4   : > { %v1799_v10 = vpack.c.bf16 %v1355_v47, %v1354_v28  ;;  %v1353_v0 = vadd.f32 %v1321_v8, %v921_v36  ;;  %v1174_v36 = vsel %vm982_vm1, %v2697_v11, 0.0  ;;  %v1298_v8 = vpop.permute.xlu1 %1297  ;;  %v1171_v11 = vsel %vm982_vm1, %v2695_v56, 0.0 }
 0x1f5   : > { %v1944_v14 = vpop.f32.mrf.mxu1  ;;  %v1332_v56 = vsel %vm1175_vm2, %v1290_v24, %v1171_v11 }
 0x1f6   : > { %1839 = vst [vmem:[%s2751_s8 + $0x48] sm:$0xff] %v1799_v10   ;;  %v1794_v21 = vpack.c.bf16 %v1353_v0, %v1352_v3  ;;  %v942_v48 = vadd.f32 %v1944_v14, %v2711_v61  ;;  %v1302_v3 = vpop.permute.xlu0 %1301 }
 0x1f7   : > { %v933_v15 = vpop.f32.mrf.mxu1 }
 0x1f8   : > { %1838 = vst [vmem:[%s2751_s8 + $0x40] sm:$0xff] %v1794_v21   ;;  %v934_v51 = vadd.f32 %v2711_v61, %v933_v15  ;;  %v1358_v25 = vadd.f32 %v1326_v30, %v942_v48  ;;  %v1334_v21 = vsel %vm1175_vm2, %v1298_v8, %v1173_v63  ;;  %v1335_v15 = vsel %vm1175_vm2, %v1302_v3, %v1174_v36 }
 0x1f9   : > { %v1945_v22 = vpop.f32.mrf.mxu1 }
 0x1fa   : > { %v945_v35 = vadd.f32 %v1945_v22, %v2711_v61  ;;  %v1356_v45 = vadd.f32 %v1324_v62, %v934_v51  ;;  %v1333_v22 = vsel %vm1175_vm2, %v1294_v37, %v1172_v20 }
 0x1fb   : > { %v936_v27 = vpop.f32.mrf.mxu1 }
 0x1fc   : > { %v1359_v33 = vadd.f32 %v1327_v59, %v945_v35  ;;  %v937_v53 = vadd.f32 %v2711_v61, %v936_v27 }
 0x1fd   : > { %v1948_v41 = vpop.f32.mrf.mxu1 }
 0x1fe   : > { %v1809_v34 = vpack.c.bf16 %v1359_v33, %v1358_v25  ;;  %v1357_v49 = vadd.f32 %v1325_v18, %v937_v53  ;;  %v958_v50 = vadd.f32 %v1948_v41, %v2711_v61 }
 0x1ff   : > { %v949_v12 = vpop.f32.mrf.mxu1 }
 0x200   : > { %1841 = vst [vmem:[%s2751_s8 + $0x58] sm:$0xff] %v1809_v34   ;;  %v1804_v46 = vpack.c.bf16 %v1357_v49, %v1356_v45  ;;  %v950_v40 = vadd.f32 %v2711_v61, %v949_v12  ;;  %v1362_v38 = vadd.f32 %v1330_v13, %v958_v50 }
 0x201   : > { %v1949_v44 = vpop.f32.mrf.mxu1 }
 0x202   : > { %1840 = vst [vmem:[%s2751_s8 + $0x50] sm:$0xff] %v1804_v46   ;;  %v961_v42 = vadd.f32 %v1949_v44, %v2711_v61  ;;  %v1360_v5 = vadd.f32 %v1328_v1, %v950_v40 }
 0x203   : > { %v952_v26 = vpop.f32.mrf.mxu1 }
 0x204   : > { %v1363_v52 = vadd.f32 %v1331_v43, %v961_v42  ;;  %v953_v29 = vadd.f32 %v2711_v61, %v952_v26 }
 0x205   : > { %v1952_v31 = vpop.f32.mrf.mxu1 }
 0x206   : > { %v1819_v39 = vpack.c.bf16 %v1363_v52, %v1362_v38  ;;  %v1361_v28 = vadd.f32 %v1329_v32, %v953_v29  ;;  %v974_v0 = vadd.f32 %v1952_v31, %v2711_v61 }
 0x207   : > { %v965_v47 = vpop.f32.mrf.mxu1 }
 0x208   : > { %1843 = vst [vmem:[%s2751_s8 + $0x68] sm:$0xff] %v1819_v39   ;;  %v1814_v10 = vpack.c.bf16 %v1361_v28, %v1360_v5  ;;  %v966_v19 = vadd.f32 %v2711_v61, %v965_v47  ;;  %v1366_v2 = vadd.f32 %v1334_v21, %v974_v0 }
 0x209   : > { %v1953_v14 = vpop.f32.mrf.mxu1 }
 0x20a   : > { %1842 = vst [vmem:[%s2751_s8 + $0x60] sm:$0xff] %v1814_v10   ;;  %v977_v6 = vadd.f32 %v1953_v14, %v2711_v61  ;;  %v1364_v4 = vadd.f32 %v1332_v56, %v966_v19 }
 0x20b   : > { %v968_v16 = vpop.f32.mrf.mxu1 }
 0x20c   : > { %v1367_v55 = vadd.f32 %v1335_v15, %v977_v6  ;;  %v969_v48 = vadd.f32 %v2711_v61, %v968_v16 }
 0x20e   : > { %v1829_v7 = vpack.c.bf16 %v1367_v55, %v1366_v2  ;;  %v1365_v51 = vadd.f32 %v1333_v22, %v969_v48 }
 0x210   : > { %1845 = vst [vmem:[%s2751_s8 + $0x78] sm:$0xff] %v1829_v7   ;;  %v1824_v61 = vpack.c.bf16 %v1365_v51, %v1364_v4 }
 0x212   : > { %1844 = vst [vmem:[%s2751_s8 + $0x70] sm:$0xff] %v1824_v61  }
 0x213   : > { %2146 = shalt.err (!%p2143_p3)
}
 0x214   : > { %s2147_s23 = scalar_lea.hbm %s2946_s13, 2048  ;;  %s2151_s30 = scalar_lea.hbm %s2999_s5, 4096 }
 0x215   : > { %p2148_p4 = scmp.ne.s32.totalorder %s2946_s13, %s2147_s23  ;;  %p2152_p9 = scmp.lt.s32.totalorder %s2946_s13, %s2999_s5 }
 0x216   : > { %p2153_p10 = scmp.lt.s32.totalorder %s2151_s30, %s2147_s23 }
 0x217   : > { %p2149_p7 = pnand %p2148_p4, %p2268_p5 }
 0x218   : > { %p2154_p11 = por %p2153_p10, %p2152_p9 }
 0x219   : > { %p2150_p8 = pneg %p2149_p7 }
 0x21b   : > { %p2155_p12 = pnand %p2154_p11, %p2150_p8 }
 0x21d   : > { %2158 = shalt.err (!%p2155_p12)
}
 0x21e   : > { %s2198_s8 = smov 64   ;;  %s2199_s9 = smov 4  }
 0x21f   : > { %1954 = dma.vmem_to_hbm [thread:$0]  (%p2268_p5), %s2948_s10, 2048, %s2946_s13, %s2954_s22, %s2198_s8, %s2198_s8, %s2199_s9  }
 0x220 PF: > { %p1960_p13 = scmp.ge.s32.totalorder %s2193_s21, 2  ;;  %s1557_s11 = sand.u32 1, %s2181_s18  }
 0x221   : > { %s1558_s12 = scalar_lea.sflag [#allocation3], %s1557_s11 }
 0x222   : > { %p1957_p0 = pnand %p1960_p13, %p2272_p6 }
 0x224   : > { %p1958_p1 = pneg %p1957_p0 }
 0x226   : > { %2176 = dma.done.wait (%p1958_p1), %s1558_s12, 2048  }
 0x227   : > { %2178 = vsyncadd (%p1958_p1), %s1558_s12, 4294965248  ;;  %p15_p2 = scmp.ge.s32.totalorder %s2255_s24, 4   ;;  %s3002_s18 = smov %s2185_s19 }
 0x228   : > { %s3003_s19 = smov %s2189_s20  ;;  %s3004_s20 = smov %s2266_s27 }
 0x229   : > { %s3005_s21 = smov %s2255_s24  ;;  %17 = sbr.rel (!%p15_p2) target bundleno = 3 (0x3), region = 75 }
 0x22e   :  { %1563 = vsyncpa [#allocation3], 1 }
 0x22f   :  { %1565 = vsyncpa [#allocation3 + $0x1], 1 }

</bundles_post_ra>
